<compile_context>
chip_gen: v5e
topology: v5e:2x2
jax: 0.10.0
libtpu: 0.0.40
codegen_flags: <defaults>
</compile_context>

<pallas_src>
import functools

import jax
import jax.numpy as jnp
from jax.experimental import pallas as pl
from jax.experimental.pallas import tpu as pltpu


# ----------------------------------------------------------------------------
# helpers
# ----------------------------------------------------------------------------
def _largest_tile(dim, unit, target):
    """Largest multiple of `unit` that divides `dim` and is <= `target`.

    Falls back to the full extent when `dim` is not a multiple of `unit`
    (a block dim is legal iff it is a multiple of the native tile or equals
    the full array extent)."""
    if dim % unit != 0:
        return dim
    t = max(unit, min(target - target % unit, dim))
    while dim % t != 0:
        t -= unit
    return t


_VMEM_LIMIT = 32 * 1024 * 1024  # safe on v5e/v6e (128 MiB phys) and v7x (64 MiB phys)


# ----------------------------------------------------------------------------
# Pass 1: gate = sigmoid(relu(mean(x) @ W1^T) @ W2^T), batched over B
# ----------------------------------------------------------------------------
def _gate_kernel(x_ref, w1t_ref, w2t_ref, s_ref, acc_ref, *, inv_len):
    # x block: (tB, C, tL); w1t: (C, Cr); w2t: (Cr, C); s out: (tB, C) f32.
    k = pl.program_id(1)

    @pl.when(k == 0)
    def _():
        acc_ref[...] = jnp.zeros_like(acc_ref)

    # Partial sum over this L tile, accumulated in f32 (per-tile cast only).
    acc_ref[...] += jnp.sum(x_ref[...].astype(jnp.float32), axis=-1)

    @pl.when(k == pl.num_programs(1) - 1)
    def _():
        y = acc_ref[...] * inv_len                                  # (tB, C) mean
        h = jnp.dot(y, w1t_ref[...].astype(jnp.float32),
                    preferred_element_type=jnp.float32)             # (tB, Cr)
        h = jnp.maximum(h, 0.0)                                     # ReLU
        z = jnp.dot(h, w2t_ref[...].astype(jnp.float32),
                    preferred_element_type=jnp.float32)             # (tB, C)
        s_ref[...] = jax.nn.sigmoid(z)                              # gate, f32


def _se_gate(x, w1t, w2t, *, l_target=512, b_target=8):
    B, C, L = x.shape
    Cr = w1t.shape[1]
    tb = _largest_tile(B, 8, b_target)
    tl = _largest_tile(L, 128, l_target)
    grid = (B // tb, L // tl)

    return pl.pallas_call(
        functools.partial(_gate_kernel, inv_len=1.0 / L),
        out_shape=jax.ShapeDtypeStruct((B, C), jnp.float32),
        grid_spec=pltpu.PrefetchScalarGridSpec(
            num_scalar_prefetch=0,
            grid=grid,
            in_specs=[
                pl.BlockSpec((tb, C, tl), lambda b, k: (b, 0, k)),
                pl.BlockSpec((C, Cr), lambda b, k: (0, 0)),
                pl.BlockSpec((Cr, C), lambda b, k: (0, 0)),
            ],
            out_specs=pl.BlockSpec((tb, C), lambda b, k: (b, 0)),
            scratch_shapes=[pltpu.VMEM((tb, C), jnp.float32)],
        ),
        compiler_params=pltpu.CompilerParams(
            dimension_semantics=("parallel", "arbitrary"),
            vmem_limit_bytes=_VMEM_LIMIT,
        ),
    )(x, w1t, w2t)


# ----------------------------------------------------------------------------
# Pass 2a: streaming scale, L tiled lane-dense (for L >= 128)
# ----------------------------------------------------------------------------
def _scale_kernel(x_ref, s_ref, o_ref):
    # x/o block: (tR, tL); s block: (tR, 1) f32. Multiply in x's dtype.
    o_ref[...] = x_ref[...] * s_ref[...].astype(x_ref.dtype)


def _se_scale_tiled(x, s, *, l_target=512, row_target=256):
    B, C, L = x.shape
    R = B * C
    x2 = x.reshape(R, L)
    s2 = s.reshape(R, 1)
    tr = _largest_tile(R, 8, row_target)
    tl = _largest_tile(L, 128, l_target)
    grid = (R // tr, L // tl)

    out = pl.pallas_call(
        _scale_kernel,
        out_shape=jax.ShapeDtypeStruct((R, L), x.dtype),
        grid_spec=pltpu.PrefetchScalarGridSpec(
            num_scalar_prefetch=0,
            grid=grid,
            in_specs=[
                pl.BlockSpec((tr, tl), lambda i, j: (i, j)),
                pl.BlockSpec((tr, 1), lambda i, j: (i, 0)),
            ],
            out_specs=pl.BlockSpec((tr, tl), lambda i, j: (i, j)),
        ),
        compiler_params=pltpu.CompilerParams(
            dimension_semantics=("parallel", "parallel"),
            vmem_limit_bytes=_VMEM_LIMIT,
        ),
    )(x2, s2)
    return out.reshape(B, C, L)


# ----------------------------------------------------------------------------
# Pass 2b: streaming scale on a flattened (B, C*L) slab (for small L)
# ----------------------------------------------------------------------------
def _scale_flat_kernel(x_ref, s_ref, o_ref, *, length):
    # x/o block: (tB, C*L) lane-dense; s block: (tB, C) f32.
    tb, cl = x_ref.shape
    c = s_ref.shape[1]
    # One-hot "repeat each channel gate `length` times" operator built from iotas
    # (no division, no reshape): expand[c0, j] = 1 iff c0*L <= j < (c0+1)*L.
    col = jax.lax.broadcasted_iota(jnp.int32, (c, cl), 1)
    lo = jax.lax.broadcasted_iota(jnp.int32, (c, cl), 0) * length
    expand = ((col >= lo) & (col < lo + length)).astype(jnp.float32)   # (C, C*L)
    srep = jnp.dot(s_ref[...], expand,
                   preferred_element_type=jnp.float32)                 # (tB, C*L) exact
    o_ref[...] = x_ref[...] * srep.astype(x_ref.dtype)


def _se_scale_flat(x, s, *, b_target=8):
    B, C, L = x.shape
    CL = C * L
    x2 = x.reshape(B, CL)
    tb = _largest_tile(B, 8, b_target)
    grid = (B // tb,)

    out = pl.pallas_call(
        functools.partial(_scale_flat_kernel, length=L),
        out_shape=jax.ShapeDtypeStruct((B, CL), x.dtype),
        grid_spec=pltpu.PrefetchScalarGridSpec(
            num_scalar_prefetch=0,
            grid=grid,
            in_specs=[
                pl.BlockSpec((tb, CL), lambda b: (b, 0)),
                pl.BlockSpec((tb, C), lambda b: (b, 0)),
            ],
            out_specs=pl.BlockSpec((tb, CL), lambda b: (b, 0)),
        ),
        compiler_params=pltpu.CompilerParams(
            dimension_semantics=("parallel",),
            vmem_limit_bytes=_VMEM_LIMIT,
        ),
    )(x2, s)
    return out.reshape(B, C, L)


# ----------------------------------------------------------------------------
# Public entry point (matches SELayer.forward)
# ----------------------------------------------------------------------------
def se_layer(x, w1, w2):
    """x: (B, C, L); w1: (C//r, C); w2: (C, C//r)  (PyTorch (out, in) layout)."""
    B, C, L = x.shape
    Cr = w1.shape[0]
    assert w1.shape == (Cr, C) and w2.shape == (C, Cr)

    # Pass 1: per-(batch, channel) gate in f32 (batched MLP, L-tiled reduction).
    s = _se_gate(x, w1.T, w2.T)                                    # (B, C) f32

    # Pass 2: streaming multiply. Pick the lane-dense layout.
    CL = C * L
    use_flat = (L < 128) and (CL % 128 == 0) and (C * CL * 4 <= (4 << 20))
    if use_flat:
        return _se_scale_flat(x, s)
    return _se_scale_tiled(x, s)


def se_layer_ref(x, w1, w2):
    """Pure-JAX reference mirroring the PyTorch forward."""
    y = jnp.mean(x, axis=2)                                        # (B, C)
    h = jnp.maximum(y @ w1.T, 0.0)                                 # (B, C//r)
    s = jax.nn.sigmoid(h @ w2.T)                                   # (B, C)
    return x * s[:, :, None]


# ----------------------------------------------------------------------------
# self-test
# ----------------------------------------------------------------------------
if __name__ == "__main__":
    def make_inputs(key, B, C, L, reduction):
        Cr = max(C // reduction, 1)
        kx, k1, k2 = jax.random.split(key, 3)
        x = jax.random.normal(kx, (B, C, L), dtype=jnp.float32)
        w1 = jax.random.uniform(k1, (Cr, C), minval=-1.0, maxval=1.0,
                                dtype=jnp.float32) / jnp.sqrt(C)
        w2 = jax.random.uniform(k2, (C, Cr), minval=-1.0, maxval=1.0,
                                dtype=jnp.float32) / jnp.sqrt(Cr)
        return x, w1, w2

    # Case 1: module defaults (channel=32, reduction=16), small L
    #         -> flattened lane-dense scale path (C*L = 512).
    x, w1, w2 = make_inputs(jax.random.PRNGKey(0), 2, 32, 16, 16)
    out = jax.block_until_ready(se_layer(x, w1, w2))
    ref = se_layer_ref(x, w1, w2)
    assert out.shape == x.shape and out.dtype == x.dtype
    assert jnp.allclose(out, ref, atol=2e-5, rtol=2e-5), "mismatch (flat path)"

    # Case 2: larger L -> L-tiled streaming path (512-wide lane-dense tiles,
    #         multi-step reduction in the gate pass).
    x, w1, w2 = make_inputs(jax.random.PRNGKey(1), 4, 128, 1024, 16)
    out = jax.block_until_ready(se_layer(x, w1, w2))
    ref = se_layer_ref(x, w1, w2)
    assert jnp.allclose(out, ref, atol=2e-5, rtol=2e-5), "mismatch (tiled path)"

    print("KERNEL_OK")
</pallas_src>

<mosaic_0001>
module attributes {stable_mosaic.version = 11 : i64} {
  func.func @_gate_kernel(%arg0: i32, %arg1: i32, %arg2: memref<2x32x16xf32, #tpu.memory_space<vmem>>, %arg3: memref<32x2xf32, #tpu.memory_space<vmem>>, %arg4: memref<2x32xf32, #tpu.memory_space<vmem>>, %arg5: memref<2x32xf32, #tpu.memory_space<vmem>>, %arg6: memref<2x32xf32, #tpu.memory_space<vmem>>) attributes {dimension_semantics = [#tpu.dimension_semantics<parallel>, #tpu.dimension_semantics<arbitrary>], iteration_bounds = array<i64: 1, 1>, scalar_prefetch = 0 : i64, scratch_operands = 1 : i64, tpu.core_type = #tpu.core_type<tc>, window_params = [{transform_indices = @transform_0, window_bounds = array<i64: 2, 32, 16>}, {pipeline_mode = #tpu.pipeline_mode<synchronous>, transform_indices = @transform_1, window_bounds = array<i64: 32, 2>}, {pipeline_mode = #tpu.pipeline_mode<synchronous>, transform_indices = @transform_2, window_bounds = array<i64: 2, 32>}, {transform_indices = @transform_3, window_bounds = array<i64: 2, 32>}]} {
    %c0_i32 = arith.constant 0 : i32
    %0 = arith.cmpi eq, %arg1, %c0_i32 : i32
    %1 = arith.extui %0 : i1 to i32
    %c0_i32_0 = arith.constant 0 : i32
    %2 = arith.cmpi ne, %1, %c0_i32_0 : i32
    scf.if %2 {
      %cst_9 = arith.constant 0.000000e+00 : f32
      %11 = vector.broadcast %cst_9 : f32 to vector<2x32xf32>
      %c0_10 = arith.constant 0 : index
      %c0_11 = arith.constant 0 : index
      %12 = vector.load %arg6[%c0_10, %c0_11] : memref<2x32xf32, #tpu.memory_space<vmem>>, vector<2x32xf32>
      tpu.vector_store %arg6[%c0_10, %c0_11], %11 {strides = array<i32>} : memref<2x32xf32, #tpu.memory_space<vmem>>, vector<2x32xf32>,
    } else {
    }
    %c0 = arith.constant 0 : index
    %c0_1 = arith.constant 0 : index
    %3 = vector.load %arg6[%c0, %c0_1] : memref<2x32xf32, #tpu.memory_space<vmem>>, vector<2x32xf32>
    %c0_2 = arith.constant 0 : index
    %c0_3 = arith.constant 0 : index
    %c0_4 = arith.constant 0 : index
    %4 = vector.load %arg2[%c0_2, %c0_3, %c0_4] : memref<2x32x16xf32, #tpu.memory_space<vmem>>, vector<2x32x16xf32>
    %cst = arith.constant dense<0.000000e+00> : vector<2x32xf32>
    %5 = vector.multi_reduction <add>, %4, %cst [2] : vector<2x32x16xf32> to vector<2x32xf32>
    %6 = arith.addf %3, %5 : vector<2x32xf32>
    %c0_5 = arith.constant 0 : index
    %c0_6 = arith.constant 0 : index
    %7 = vector.load %arg6[%c0_5, %c0_6] : memref<2x32xf32, #tpu.memory_space<vmem>>, vector<2x32xf32>
    tpu.vector_store %arg6[%c0_5, %c0_6], %6 {strides = array<i32>} : memref<2x32xf32, #tpu.memory_space<vmem>>, vector<2x32xf32>,
    %c0_i32_7 = arith.constant 0 : i32
    %8 = arith.cmpi eq, %arg1, %c0_i32_7 : i32
    %9 = arith.extui %8 : i1 to i32
    %c0_i32_8 = arith.constant 0 : i32
    %10 = arith.cmpi ne, %9, %c0_i32_8 : i32
    scf.if %10 {
      %c0_9 = arith.constant 0 : index
      %c0_10 = arith.constant 0 : index
      %11 = vector.load %arg6[%c0_9, %c0_10] : memref<2x32xf32, #tpu.memory_space<vmem>>, vector<2x32xf32>
      %cst_11 = arith.constant 6.250000e-02 : f32
      %12 = vector.broadcast %cst_11 : f32 to vector<2x32xf32>
      %13 = arith.mulf %11, %12 : vector<2x32xf32>
      %c0_12 = arith.constant 0 : index
      %c0_13 = arith.constant 0 : index
      %14 = vector.load %arg3[%c0_12, %c0_13] : memref<32x2xf32, #tpu.memory_space<vmem>>, vector<32x2xf32>
      %cst_14 = arith.constant dense<0.000000e+00> : vector<2x2xf32>
      %15 = tpu.matmul %13, %14, %cst_14 {dimension_numbers = #tpu.dot_dimension_numbers<[1], [0], [0], [1], [0, 0, 1, 1], [], []>} : vector<2x32xf32>, vector<32x2xf32>, vector<2x2xf32> -> vector<2x2xf32>
      %cst_15 = arith.constant 0.000000e+00 : f32
      %16 = vector.broadcast %cst_15 : f32 to vector<2x2xf32>
      %17 = arith.maximumf %15, %16 : vector<2x2xf32>
      %c0_16 = arith.constant 0 : index
      %c0_17 = arith.constant 0 : index
      %18 = vector.load %arg4[%c0_16, %c0_17] : memref<2x32xf32, #tpu.memory_space<vmem>>, vector<2x32xf32>
      %cst_18 = arith.constant dense<0.000000e+00> : vector<2x32xf32>
      %19 = tpu.matmul %17, %18, %cst_18 {dimension_numbers = #tpu.dot_dimension_numbers<[1], [0], [0], [1], [0, 0, 1, 1], [], []>} : vector<2x2xf32>, vector<2x32xf32>, vector<2x32xf32> -> vector<2x32xf32>
      %20 = arith.negf %19 : vector<2x32xf32>
      %21 = math.exp %20 : vector<2x32xf32>
      %cst_19 = arith.constant 1.000000e+00 : f32
      %22 = vector.broadcast %cst_19 : f32 to vector<2x32xf32>
      %23 = arith.addf %22, %21 : vector<2x32xf32>
      %24 = arith.divf %22, %23 : vector<2x32xf32>
      %c0_20 = arith.constant 0 : index
      %c0_21 = arith.constant 0 : index
      %25 = vector.load %arg5[%c0_20, %c0_21] : memref<2x32xf32, #tpu.memory_space<vmem>>, vector<2x32xf32>
      tpu.vector_store %arg5[%c0_20, %c0_21], %24 {strides = array<i32>} : memref<2x32xf32, #tpu.memory_space<vmem>>, vector<2x32xf32>,
    } else {
    }
    return
  }
  func.func @transform_0(%arg0: i32, %arg1: i32) -> (i32, i32, i32) {
    %c0_i32 = arith.constant 0 : i32
    %c0_i32_0 = arith.constant 0 : i32
    return %arg0, %c0_i32, %arg1 : i32, i32, i32
  }
  func.func @transform_1(%arg0: i32, %arg1: i32) -> (i32, i32) {
    %c0_i32 = arith.constant 0 : i32
    %c0_i32_0 = arith.constant 0 : i32
    %c0_i32_1 = arith.constant 0 : i32
    return %c0_i32, %c0_i32_0 : i32, i32
  }
  func.func @transform_2(%arg0: i32, %arg1: i32) -> (i32, i32) {
    %c0_i32 = arith.constant 0 : i32
    %c0_i32_0 = arith.constant 0 : i32
    %c0_i32_1 = arith.constant 0 : i32
    return %c0_i32, %c0_i32_0 : i32, i32
  }
  func.func @transform_3(%arg0: i32, %arg1: i32) -> (i32, i32) {
    %c0_i32 = arith.constant 0 : i32
    %c0_i32_0 = arith.constant 0 : i32
    return %arg0, %c0_i32 : i32, i32
  }
}

</mosaic_0001>

<bundles_post_ra>
// kernel: tpu_custom_call.1
= control target key start
LH: loop header
LB: loop body
LE: loop exit
PB: predicated region body
PF: predicated region fallthrough
CT: control target
= control target key end

     0   :  { %vm30_vm0 = vcmask 130048   ;;  %s301_s0 = inlined_call_operand.vmem [shape: f32[2,32,16], index: 0, kind: input, shape index: {}]   ;;  %s302_s1 = inlined_call_operand.vmem [shape: f32[32,2], index: 1, kind: input, shape index: {}]   ;;  %s303_s2 = inlined_call_operand.vmem [shape: f32[2,32], index: 2, kind: input, shape index: {}]   ;;  %s304_s3 = inlined_call_operand.hbm [shape: f32[2,32], index: 3, kind: output, shape index: {}]  }
   0x1   :  { %v26_v0 = vld [vmem:[%s301_s0 + $0x20] sm:$0xff]  ;;  %v24_v2 = vld [vmem:[%s301_s0 + $0x10] sm:$0xff] }
   0x2   :  { %v22_v1 = vld [vmem:[%s301_s0] sm:$0xff]  ;;  %v43_v3 = vsel %vm30_vm0, %v26_v0, 0.0  ;;  %v37_v5 = vsel %vm30_vm0, %v24_v2, 0.0 }
   0x3   :  { %v31_v4 = vsel %vm30_vm0, %v22_v1, 0.0  ;;  %44 = vadd.xlane.f32.xlu1 %v43_v3  ;;  %38 = vadd.xlane.f32.xlu2 %v37_v5 }
   0x4   :  { %32 = vadd.xlane.f32.xlu0 %v31_v4 }
   0x5   :  { %8 = vsyncpa [#allocation4], 0  ;;  %v27_v6 = vld [vmem:[%s301_s0 + $0x28] sm:$0xff]  ;;  %v28_v8 = vld [vmem:[%s301_s0 + $0x30] sm:$0xff]  ;;  %vm19_vm1 = vcmask 254976   ;;  %v226_v16 = vmov 0.0   ;;  %v63_v23 = vlaneseq }
   0x6   :  { %v23_v7 = vld [vmem:[%s301_s0 + $0x8] sm:$0xff]  ;;  %v46_v9 = vsel %vm30_vm0, %v27_v6, 0.0  ;;  %v49_v11 = vsel %vm30_vm0, %v28_v8, 0.0  ;;  %v29_v12 = vld [vmem:[%s301_s0 + $0x38] sm:$0xff]  ;;  %20 = vst.msk [vmem:[#allocation2] sm:$0x3] %vm19_vm1, %v226_v16 }
   0x7   :  { %v34_v10 = vsel %vm30_vm0, %v23_v7, 0.0  ;;  %v25_v13 = vld [vmem:[%s301_s0 + $0x18] sm:$0xff]  ;;  %v52_v14 = vsel %vm30_vm0, %v29_v12, 0.0  ;;  %v98_v18 = vld [vmem:[%s302_s1 + $0x10] sm:$0xff]  ;;  %v97_v19 = vld [vmem:[%s302_s1 + $0x8] sm:$0xff]  ;;  %v64_v25 = vand.u32 127, %v63_v23 }
   0x8   :  { %v40_v15 = vsel %vm30_vm0, %v25_v13, 0.0  ;;  %v99_v17 = vld [vmem:[%s302_s1 + $0x18] sm:$0xff]  ;;  %v96_v20 = vld [vmem:[%s302_s1] sm:$0xff]  ;;  %vm68_vm2 = vcmask 130112   ;;  %vm72_vm3 = vcmask 195712   ;;  %vm76_vm4 = vcmask 261312  }
   0x9   :  { %116 = vmatpush.msra.mxu0 %v99_v17  ;;  %v66_v26 = vadd.s32 4294967288, %v64_v25  ;;  %v70_v32 = vadd.s32 4294967280, %v64_v25  ;;  %v74_v35 = vadd.s32 4294967272, %v64_v25  ;;  %vm85_vm5 = vcmask 1041409   ;;  %v125_v53 = vld [vmem:[%s303_s2] sm:$0x3] }
   0xa   :  { %vm100_vm6 = vcmask 261120   ;;  %vm130_vm7 = vcmask 1041408   ;;  %vm126_vm8 = vcmask 15360   ;;  %s227_s2 = smov [#allocation3]   ;;  %s181_s12 = sshll.u32 %s304_s3, 4  ;;  %s182_s12 = int_to_ptr.hbm [resolvable:$true] %s181_s12 }
   0xb   :  { %47 = vadd.xlane.f32.xlu1 %v46_v9  ;;  %50 = vadd.xlane.f32.xlu2 %v49_v11  ;;  %s179_s9 = sshll.u32 %s227_s2, 4  ;;  %s180_s9 = int_to_ptr.vmem [resolvable:$true] %s179_s9 }
   0xc   :  { %35 = vadd.xlane.f32.xlu0 %v34_v10  ;;  %117 = vmatpush.msra.mxu0 %v98_v18 }
   0xd   :  { %v21_v46 = vld [vmem:[#allocation2] sm:$0x3]  ;;  %191 = vmatpush.msk.msra.mxu1 %vm130_vm7, %v125_v53 }
   0xe   :  { %118 = vmatpush.msra.mxu0 %v97_v19 }
  0x10   :  { %119 = vmatpush.msra.mxu0 %v96_v20 }
  0x13   :  { %53 = vadd.xlane.f32.xlu1 %v52_v14 }
  0x14   :  { %41 = vadd.xlane.f32.xlu0 %v40_v15 }
  0x76   :  { %v45_v21 = vpop.xlane.xlu1 %44  ;;  %v39_v24 = vpop.xlane.xlu2 %38 }
  0x77   :  { %v33_v22 = vpop.xlane.xlu0 %32  ;;  %v78_v33 = vperm.slane %v45_v21, %v64_v25  ;;  %v71_v39 = vperm.slane %v39_v24, %v70_v32 }
  0x78   :  { %v65_v34 = vperm.slane %v33_v22, %v64_v25 }
  0x7e   :  { %v48_v27 = vpop.xlane.xlu1 %47  ;;  %v51_v31 = vpop.xlane.xlu2 %50 }
  0x7f   :  { %v36_v28 = vpop.xlane.xlu0 %35  ;;  %v79_v29 = vperm.slane %v48_v27, %v66_v26  ;;  %v81_v36 = vperm.slane %v51_v31, %v70_v32 }
  0x80   :  { %v67_v30 = vperm.slane %v36_v28, %v66_v26 }
  0x81   :  { %v80_v37 = vsel %vm68_vm2, %v79_v29, %v78_v33 }
  0x82   :  { %v69_v38 = vsel %vm68_vm2, %v67_v30, %v65_v34  ;;  %v82_v44 = vsel %vm72_vm3, %v81_v36, %v80_v37 }
  0x83   :  { %v73_v45 = vsel %vm72_vm3, %v71_v39, %v69_v38 }
  0x86   :  { %v54_v40 = vpop.xlane.xlu1 %53 }
  0x87   :  { %v42_v41 = vpop.xlane.xlu0 %41  ;;  %v83_v42 = vperm.slane %v54_v40, %v74_v35 }
  0x88   :  { %v75_v43 = vperm.slane %v42_v41, %v74_v35 }
  0x89   :  { %v84_v47 = vsel %vm76_vm4, %v83_v42, %v82_v44 }
  0x8a   :  { %v77_v48 = vsel %vm76_vm4, %v75_v43, %v73_v45 }
  0x8b   :  { %v86_v49 = vsel %vm85_vm5, %v84_v47, %v77_v48 }
  0x8c   :  { %v88_v50 = vadd.f32 %v86_v49, %v21_v46 }
  0x8e   :  { %90 = vst.msk [vmem:[#allocation2] sm:$0x3] %vm19_vm1, %v88_v50 }
  0x95   :  { %v94_v51 = vld [vmem:[#allocation2] sm:$0x3] }
  0x96   :  { %v95_v52 = vmul.f32 0.0625, %v94_v51 }
  0x98   :  { %190 = vmatmul.msk.f32.vlgmr.msra.gmra.mxu0 %vm100_vm6, %v95_v52 }
 0x115   :  { %v121_v54 = vpop.f32.mrf.mxu0 }
 0x116   :  { %v124_v55 = vmax.f32 %v121_v54, 0.0 }
 0x118   :  { %192 = vmatmul.msk.f32.vlgmr.msra.gmra.mxu1 %vm126_vm8, %v124_v55 }
 0x195   :  { %v151_v56 = vpop.f32.mrf.mxu1 }
 0x196   :  { %v193_v57 = vmul.f32 -1.442695, %v151_v56 }
 0x198   :  { %196 = vpow2.f32 %v193_v57 }
 0x19e   :  { %v197_v58 = vpop.eup %196 }
 0x19f   :  { %v157_v59 = vadd.f32 1.0, %v197_v58 }
 0x1a1   :  { %198 = vrcp.f32 %v157_v59  ;;  %v169_v63 = vand.u32 2147483648, %v157_v59  ;;  %v167_v1 = vand.u32 2147483647, %v157_v59  ;;  %vm163_vm10 = vweird.f32 %v157_v59 }
 0x1a3   :  { %v170_v3 = vor.u32 1.1754944e-38, %v169_v63  ;;  %vm168_vm12 = vcmp.eq.f32.partialorder %v167_v1, 8.507059e+37 }
 0x1a7   :  { %v199_v60 = vpop.eup %198 }
 0x1a8   :  { %v159_v61 = vmul.f32 %v199_v60, %v157_v59  ;;  %vm164_vm9 = vweird.f32 %v199_v60 }
 0x1a9   :  { %vm165_vm11 = vmor %vm163_vm10, %vm164_vm9 }
 0x1aa   :  { %v160_v62 = vsub.f32 1.0, %v159_v61 }
 0x1ac   :  { %v161_v0 = vmul.f32 %v199_v60, %v160_v62 }
 0x1ae   :  { %v162_v2 = vadd.f32 %v199_v60, %v161_v0 }
 0x1b0   :  { %v166_v4 = vsel %vm165_vm11, %v199_v60, %v162_v2 }
 0x1b1   :  { %v171_v5 = vsel %vm168_vm12, %v170_v3, %v166_v4 }
 0x1b2   :  { %173 = vst.msk [vmem:[#allocation3] sm:$0x3] %vm19_vm1, %v171_v5 }
 0x1b3   :  { %184 = dma.vmem_to_hbm [thread:$0]  %s180_s9, 32, %s182_s12, [#allocation4]  }
 0x1b4   :  { %224 = dma.done.wait [#allocation4], 32  }
 0x1b5   :  { %225 = vsyncadd [#allocation4], 4294967264 }
 0x1b6   :  { %189 = vsyncpa [#allocation4], 1 }

</bundles_post_ra>
